<compile_context>
chip_gen: v6e
topology: v6e:2x2x1
jax: 0.10.0
libtpu: 0.0.40
codegen_flags: <defaults>
</compile_context>

<pallas_src>
import math

import jax
import jax.numpy as jnp
from jax import lax
from jax.experimental import pallas as pl
from jax.experimental.pallas import tpu as pltpu


# ----------------------------------------------------------------------------
# Plain-JAX grouping glue (data-dependent gathers / sorts).
# TODO(synk): no clean Pallas equivalent for these data-dependent sorts/gathers;
# they remain XLA ops and will dominate end-to-end time at production sizes.
# ----------------------------------------------------------------------------

def square_distance(src, dst):
    # src: [B, N, C], dst: [B, M, C] -> [B, N, M]
    return jnp.sum((src[:, :, None, :] - dst[:, None, :, :]) ** 2, axis=-1)


def index_points(points, idx):
    # points: [B, N, C], idx: [B, ...] -> [B, ..., C]
    B = points.shape[0]
    batch_idx = jnp.arange(B).reshape((B,) + (1,) * (idx.ndim - 1))
    return points[batch_idx, idx]


def farthest_point_sample(xyz, npoint):
    # xyz: [B, N, 3] -> centroids: [B, npoint] int32
    # TODO(synk): torch version starts from a random point (torch.randint); we
    # start deterministically from index 0 for reproducibility.
    B, N, _ = xyz.shape

    def body(i, carry):
        centroids, distance, farthest = carry
        centroids = centroids.at[:, i].set(farthest)
        centroid = jnp.take_along_axis(xyz, farthest[:, None, None], axis=1)  # [B,1,3]
        dist = jnp.sum((xyz - centroid) ** 2, axis=-1)
        distance = jnp.minimum(distance, dist)
        farthest = jnp.argmax(distance, axis=-1).astype(jnp.int32)
        return centroids, distance, farthest

    centroids = jnp.zeros((B, npoint), dtype=jnp.int32)
    distance = jnp.full((B, N), 1e10, dtype=xyz.dtype)
    farthest = jnp.zeros((B,), dtype=jnp.int32)
    centroids, _, _ = lax.fori_loop(0, npoint, body, (centroids, distance, farthest))
    return centroids


def query_ball_point(radius, nsample, xyz, new_xyz):
    B, N, _ = xyz.shape
    S = new_xyz.shape[1]
    group_idx = jnp.broadcast_to(jnp.arange(N, dtype=jnp.int32), (B, S, N))
    sqrdists = square_distance(new_xyz, xyz)
    group_idx = jnp.where(sqrdists > radius ** 2, jnp.int32(N), group_idx)
    group_idx = jnp.sort(group_idx, axis=-1)[:, :, :nsample]
    group_first = jnp.broadcast_to(group_idx[:, :, :1], (B, S, nsample))
    mask = group_idx == N
    group_idx = jnp.where(mask, group_first, group_idx)
    return group_idx


def sample_and_group(npoint, radius, nsample, xyz, points, knn=False):
    new_xyz = index_points(xyz, farthest_point_sample(xyz, npoint))  # [B, S, 3]
    if knn:
        dists = square_distance(new_xyz, xyz)
        idx = jnp.argsort(dists, axis=-1)[:, :, :nsample]
    else:
        idx = query_ball_point(radius, nsample, xyz, new_xyz)
    grouped_xyz = index_points(xyz, idx)                             # [B, S, K, 3]
    grouped_xyz_norm = grouped_xyz - new_xyz[:, :, None, :]
    if points is not None:
        grouped_points = index_points(points, idx)                   # [B, S, K, D]
        new_points = jnp.concatenate([grouped_xyz_norm, grouped_points], axis=-1)
    else:
        new_points = grouped_xyz_norm
    return new_xyz, new_points                                        # [B,S,3], [B,S,K,3+D]


def sample_and_group_all(xyz, points):
    B, N, C = xyz.shape
    new_xyz = jnp.zeros((B, 1, C), dtype=xyz.dtype)
    grouped_xyz = xyz.reshape(B, 1, N, C)
    if points is not None:
        new_points = jnp.concatenate([grouped_xyz, points.reshape(B, 1, N, -1)], axis=-1)
    else:
        new_points = grouped_xyz
    return new_xyz, new_points


# ----------------------------------------------------------------------------
# Pallas kernel: per-point MLP (1x1 conv + folded BN + ReLU) + running max over K
# ----------------------------------------------------------------------------

def _round_up(x, m):
    return ((x + m - 1) // m) * m


def _mlp_max_kernel(x_ref, *refs):
    """x_ref: (K, TILE_M, CinP) bf16.  refs = w1, b1, ..., wn, bn, out_ref.

    Processes one K-slice (TILE_M, CinP) at a time through the whole MLP
    (bf16 MXU matmuls, f32 accumulation, f32 bias+ReLU on the VPU) and keeps a
    running elementwise max over K.  Output block (TILE_M, CoutP) is lane-dense
    (CoutP is a multiple of 128), so stores are unmasked full-width vst.
    """
    out_ref = refs[-1]
    wb = refs[:-1]
    n_layers = len(wb) // 2
    K = x_ref.shape[0]

    # Load the (VMEM-resident) weights / biases once, outside the K loop.
    ws = [wb[2 * i][...] for i in range(n_layers)]        # bf16 [CiP, CoP]
    bs = [wb[2 * i + 1][...] for i in range(n_layers)]    # f32  [1, CoP]

    def mlp(h):
        # h: (TILE_M, CinP) bf16 -> (TILE_M, CoutP) f32
        for i in range(n_layers):
            hf = jnp.dot(h, ws[i], preferred_element_type=jnp.float32) + bs[i]
            hf = jnp.maximum(hf, 0.0)                      # ReLU in f32
            h = hf.astype(jnp.bfloat16) if i + 1 < n_layers else hf
        return h

    def body(k, acc):
        return jnp.maximum(acc, mlp(x_ref[k]))             # running max over K (VPU)

    init = jnp.full(out_ref.shape, -jnp.inf, dtype=jnp.float32)
    out_ref[...] = lax.fori_loop(0, K, body, init, unroll=min(int(K), 8))


def pointnet_mlp_max(grouped, weights, biases, *, tile_m=512):
    """grouped: [B, S, K, Cin] f32; weights[i]: [Ci, Co] (BN-folded); biases[i]: [1, Co].

    Returns [B, S, Cout] f32 = max over K of ReLU(MLP(grouped)).
    """
    B, S, K, Cin = grouped.shape
    n_layers = len(weights)
    Cout = weights[-1].shape[1]

    # --- pad every channel dim to a multiple of 128 (lane / MXU width); padded
    #     weight rows/cols and bias entries are zero so ReLU(0)=0 extra channels
    #     never perturb the result and are sliced off at the end. ---------------
    chans = [Cin] + [w.shape[1] for w in weights]
    chans_p = [_round_up(c, 128) for c in chans]
    CinP, CoutP = chans_p[0], chans_p[-1]

    w_pad, b_pad = [], []
    for i, (w, b) in enumerate(zip(weights, biases)):
        wp = jnp.zeros((chans_p[i], chans_p[i + 1]), jnp.float32)
        wp = wp.at[: w.shape[0], : w.shape[1]].set(w)
        bp = jnp.zeros((1, chans_p[i + 1]), jnp.float32)
        bp = bp.at[:, : b.shape[1]].set(b)
        w_pad.append(wp.astype(jnp.bfloat16))   # bf16 MXU inputs
        b_pad.append(bp)                        # bias stays f32 (VPU math in f32)

    # --- rows = flattened (batch, centroid); K is the leading axis so the
    #     in-kernel K-loop slices a contiguous (tile_m, CinP) tile. -------------
    M = B * S
    tile_m = max(8, min(tile_m, _round_up(M, 8)))
    Mp = _round_up(M, tile_m)
    x = jnp.transpose(grouped.reshape(M, K, Cin), (1, 0, 2))        # [K, M, Cin]
    x = jnp.pad(x, ((0, 0), (0, Mp - M), (0, CinP - Cin)))
    x = x.astype(jnp.bfloat16)                                      # [K, Mp, CinP]

    in_specs = [pl.BlockSpec((K, tile_m, CinP), lambda i: (0, i, 0))]
    operands = [x]
    for wp, bp in zip(w_pad, b_pad):
        # Constant index_map -> weights/biases stay VMEM-resident (no re-DMA).
        in_specs.append(pl.BlockSpec(wp.shape, lambda i: (0, 0)))
        in_specs.append(pl.BlockSpec(bp.shape, lambda i: (0, 0)))
        operands.append(wp)
        operands.append(bp)

    flops = 2 * Mp * K * sum(chans_p[i] * chans_p[i + 1] for i in range(n_layers))
    bytes_accessed = (x.size * 2
                      + sum(wp.size * 2 + bp.size * 4 for wp, bp in zip(w_pad, b_pad))
                      + Mp * CoutP * 4)

    out = pl.pallas_call(
        _mlp_max_kernel,
        out_shape=jax.ShapeDtypeStruct((Mp, CoutP), jnp.float32),
        grid=(Mp // tile_m,),
        in_specs=in_specs,
        out_specs=pl.BlockSpec((tile_m, CoutP), lambda i: (i, 0)),
        compiler_params=pltpu.CompilerParams(
            dimension_semantics=("parallel",),
            vmem_limit_bytes=48 * 1024 * 1024),   # fits v7x's 64 MiB VMEM with headroom
        cost_estimate=pl.CostEstimate(flops=int(flops), transcendentals=0,
                                      bytes_accessed=int(bytes_accessed)),
    )(*operands)

    return out[:M, :Cout].reshape(B, S, Cout)


# ----------------------------------------------------------------------------
# Module: parameter init + forward
# ----------------------------------------------------------------------------

class PointNetSetAbstraction:
    def __init__(self, npoint, radius, nsample, in_channel, mlp, group_all,
                 knn=False, key=None):
        self.npoint = npoint
        self.radius = radius
        self.nsample = nsample
        self.knn = knn
        self.group_all = group_all
        self.weights = []   # BN-folded, transposed conv weights  [Ci, Co]
        self.biases = []    # BN-folded biases                    [1, Co]

        # Deterministic parameter init; BatchNorm folded in eval mode
        # (running_mean=0, running_var=1, gamma=1, beta=0, eps=1e-5).
        # TODO(synk): training-mode BN (batch statistics) is not computed in-kernel.
        if key is None:
            key = jax.random.PRNGKey(42)
        eps = 1e-5
        last_channel = in_channel
        for out_channel in mlp:
            key, kw, kb = jax.random.split(key, 3)
            bound = 1.0 / math.sqrt(last_channel)
            w = jax.random.uniform(kw, (out_channel, last_channel), jnp.float32,
                                   minval=-bound, maxval=bound)     # conv weight [Co, Ci]
            b = jax.random.uniform(kb, (out_channel,), jnp.float32,
                                   minval=-bound, maxval=bound)     # conv bias   [Co]
            gamma = jnp.ones((out_channel,), jnp.float32)
            beta = jnp.zeros((out_channel,), jnp.float32)
            r_mean = jnp.zeros((out_channel,), jnp.float32)
            r_var = jnp.ones((out_channel,), jnp.float32)
            scale = gamma / jnp.sqrt(r_var + eps)
            w_fold = (w * scale[:, None]).T                          # [Ci, Co]
            b_fold = ((b - r_mean) * scale + beta)[None, :]          # [1, Co]
            self.weights.append(w_fold)
            self.biases.append(b_fold)
            last_channel = out_channel

    def _group(self, xyz, points):
        if self.group_all:
            return sample_and_group_all(xyz, points)
        return sample_and_group(self.npoint, self.radius, self.nsample,
                                xyz, points, knn=self.knn)

    def __call__(self, xyz, points):
        # xyz: [B, N, 3], points: [B, N, D] (or None)
        new_xyz, new_points = self._group(xyz, points)
        # new_points: [B, S, K, 3+D]  (channels-last)
        out = pointnet_mlp_max(new_points, self.weights, self.biases)  # [B, S, mlp[-1]]
        return new_xyz, out

    def reference(self, xyz, points):
        """Pure-JAX reference mirroring the kernel numerics (bf16 matmul inputs,
        f32 accumulation / bias / ReLU), for checking the Pallas path."""
        new_xyz, new_points = self._group(xyz, points)
        h = new_points
        n_layers = len(self.weights)
        for i, (w, b) in enumerate(zip(self.weights, self.biases)):
            hf = jnp.einsum("bskc,cd->bskd",
                            h.astype(jnp.bfloat16), w.astype(jnp.bfloat16),
                            preferred_element_type=jnp.float32) + b[None, None]
            hf = jnp.maximum(hf, 0.0)
            h = hf
        return new_xyz, jnp.max(h, axis=2)


# ----------------------------------------------------------------------------
# Main
# ----------------------------------------------------------------------------

if __name__ == "__main__":
    B, N, D = 2, 32, 4
    npoint, radius, nsample = 8, 0.8, 8
    mlp_channels = [16, 32]

    key = jax.random.PRNGKey(0)
    kx, kp, kparam = jax.random.split(key, 3)
    xyz = jax.random.normal(kx, (B, N, 3), jnp.float32)
    points = jax.random.normal(kp, (B, N, D), jnp.float32)

    sa = PointNetSetAbstraction(
        npoint=npoint, radius=radius, nsample=nsample,
        in_channel=3 + D, mlp=mlp_channels, group_all=False, knn=False, key=kparam)

    new_xyz, new_feats = sa(xyz, points)
    new_xyz = jax.block_until_ready(new_xyz)
    new_feats = jax.block_until_ready(new_feats)

    # sanity check against pure-JAX reference (same bf16 matmul numerics)
    ref_xyz, ref_feats = sa.reference(xyz, points)
    assert new_xyz.shape == (B, npoint, 3)
    assert new_feats.shape == (B, npoint, mlp_channels[-1])
    assert jnp.allclose(new_xyz, ref_xyz, atol=1e-5, rtol=1e-5)
    assert jnp.allclose(new_feats, ref_feats, atol=1e-2, rtol=1e-2)

    print("KERNEL_OK")
</pallas_src>

<mosaic_0001>
module attributes {stable_mosaic.version = 11 : i64} {
  func.func @_mlp_max_kernel(%arg0: i32, %arg1: memref<8x16x128xbf16, #tpu.memory_space<vmem>>, %arg2: memref<128x128xbf16, #tpu.memory_space<vmem>>, %arg3: memref<1x128xf32, #tpu.memory_space<vmem>>, %arg4: memref<128x128xbf16, #tpu.memory_space<vmem>>, %arg5: memref<1x128xf32, #tpu.memory_space<vmem>>, %arg6: memref<16x128xf32, #tpu.memory_space<vmem>>) attributes {dimension_semantics = [#tpu.dimension_semantics<parallel>], iteration_bounds = array<i64: 1>, scalar_prefetch = 0 : i64, scratch_operands = 0 : i64, tpu.core_type = #tpu.core_type<tc>, window_params = [{transform_indices = @transform_0, window_bounds = array<i64: 8, 16, 128>}, {pipeline_mode = #tpu.pipeline_mode<synchronous>, transform_indices = @transform_1, window_bounds = array<i64: 128, 128>}, {pipeline_mode = #tpu.pipeline_mode<synchronous>, transform_indices = @transform_2, window_bounds = array<i64: 1, 128>}, {pipeline_mode = #tpu.pipeline_mode<synchronous>, transform_indices = @transform_3, window_bounds = array<i64: 128, 128>}, {pipeline_mode = #tpu.pipeline_mode<synchronous>, transform_indices = @transform_4, window_bounds = array<i64: 1, 128>}, {transform_indices = @transform_5, window_bounds = array<i64: 16, 128>}]} {
    %c0 = arith.constant 0 : index
    %c0_0 = arith.constant 0 : index
    %0 = vector.load %arg2[%c0, %c0_0] : memref<128x128xbf16, #tpu.memory_space<vmem>>, vector<128x128xbf16>
    %c0_1 = arith.constant 0 : index
    %c0_2 = arith.constant 0 : index
    %1 = vector.load %arg4[%c0_1, %c0_2] : memref<128x128xbf16, #tpu.memory_space<vmem>>, vector<128x128xbf16>
    %c0_3 = arith.constant 0 : index
    %c0_4 = arith.constant 0 : index
    %2 = vector.load %arg3[%c0_3, %c0_4] : memref<1x128xf32, #tpu.memory_space<vmem>>, vector<1x128xf32>
    %c0_5 = arith.constant 0 : index
    %c0_6 = arith.constant 0 : index
    %3 = vector.load %arg5[%c0_5, %c0_6] : memref<1x128xf32, #tpu.memory_space<vmem>>, vector<1x128xf32>
    %cst = arith.constant 0xFF800000 : f32
    %4 = vector.broadcast %cst : f32 to vector<16x128xf32>
    %c0_i32 = arith.constant 0 : i32
    %5 = arith.index_cast %c0_i32 : i32 to index
    %c0_7 = arith.constant 0 : index
    %c0_8 = arith.constant 0 : index
    %6 = vector.load %arg1[%5, %c0_7, %c0_8] : memref<8x16x128xbf16, #tpu.memory_space<vmem>>, vector<1x16x128xbf16>
    %7 = vector.shape_cast %6 : vector<1x16x128xbf16> to vector<16x128xbf16>
    %cst_9 = arith.constant dense<0.000000e+00> : vector<16x128xf32>
    %8 = tpu.matmul %7, %0, %cst_9 {dimension_numbers = #tpu.dot_dimension_numbers<[1], [0], [0], [1], [0, 0, 1, 1], [], []>} : vector<16x128xbf16>, vector<128x128xbf16>, vector<16x128xf32> -> vector<16x128xf32>
    %9 = vector.broadcast %2 : vector<1x128xf32> to vector<16x128xf32>
    %10 = arith.addf %8, %9 : vector<16x128xf32>
    %cst_10 = arith.constant 0.000000e+00 : f32
    %11 = vector.broadcast %cst_10 : f32 to vector<16x128xf32>
    %12 = arith.maximumf %10, %11 : vector<16x128xf32>
    %13 = arith.truncf %12 : vector<16x128xf32> to vector<16x128xbf16>
    %cst_11 = arith.constant dense<0.000000e+00> : vector<16x128xf32>
    %14 = tpu.matmul %13, %1, %cst_11 {dimension_numbers = #tpu.dot_dimension_numbers<[1], [0], [0], [1], [0, 0, 1, 1], [], []>} : vector<16x128xbf16>, vector<128x128xbf16>, vector<16x128xf32> -> vector<16x128xf32>
    %15 = vector.broadcast %3 : vector<1x128xf32> to vector<16x128xf32>
    %16 = arith.addf %14, %15 : vector<16x128xf32>
    %cst_12 = arith.constant 0.000000e+00 : f32
    %17 = vector.broadcast %cst_12 : f32 to vector<16x128xf32>
    %18 = arith.maximumf %16, %17 : vector<16x128xf32>
    %19 = arith.maximumf %4, %18 : vector<16x128xf32>
    %c1_i32 = arith.constant 1 : i32
    %20 = arith.index_cast %c1_i32 : i32 to index
    %c0_13 = arith.constant 0 : index
    %c0_14 = arith.constant 0 : index
    %21 = vector.load %arg1[%20, %c0_13, %c0_14] : memref<8x16x128xbf16, #tpu.memory_space<vmem>>, vector<1x16x128xbf16>
    %22 = vector.shape_cast %21 : vector<1x16x128xbf16> to vector<16x128xbf16>
    %cst_15 = arith.constant dense<0.000000e+00> : vector<16x128xf32>
    %23 = tpu.matmul %22, %0, %cst_15 {dimension_numbers = #tpu.dot_dimension_numbers<[1], [0], [0], [1], [0, 0, 1, 1], [], []>} : vector<16x128xbf16>, vector<128x128xbf16>, vector<16x128xf32> -> vector<16x128xf32>
    %24 = vector.broadcast %2 : vector<1x128xf32> to vector<16x128xf32>
    %25 = arith.addf %23, %24 : vector<16x128xf32>
    %cst_16 = arith.constant 0.000000e+00 : f32
    %26 = vector.broadcast %cst_16 : f32 to vector<16x128xf32>
    %27 = arith.maximumf %25, %26 : vector<16x128xf32>
    %28 = arith.truncf %27 : vector<16x128xf32> to vector<16x128xbf16>
    %cst_17 = arith.constant dense<0.000000e+00> : vector<16x128xf32>
    %29 = tpu.matmul %28, %1, %cst_17 {dimension_numbers = #tpu.dot_dimension_numbers<[1], [0], [0], [1], [0, 0, 1, 1], [], []>} : vector<16x128xbf16>, vector<128x128xbf16>, vector<16x128xf32> -> vector<16x128xf32>
    %30 = vector.broadcast %3 : vector<1x128xf32> to vector<16x128xf32>
    %31 = arith.addf %29, %30 : vector<16x128xf32>
    %cst_18 = arith.constant 0.000000e+00 : f32
    %32 = vector.broadcast %cst_18 : f32 to vector<16x128xf32>
    %33 = arith.maximumf %31, %32 : vector<16x128xf32>
    %34 = arith.maximumf %19, %33 : vector<16x128xf32>
    %c2_i32 = arith.constant 2 : i32
    %35 = arith.index_cast %c2_i32 : i32 to index
    %c0_19 = arith.constant 0 : index
    %c0_20 = arith.constant 0 : index
    %36 = vector.load %arg1[%35, %c0_19, %c0_20] : memref<8x16x128xbf16, #tpu.memory_space<vmem>>, vector<1x16x128xbf16>
    %37 = vector.shape_cast %36 : vector<1x16x128xbf16> to vector<16x128xbf16>
    %cst_21 = arith.constant dense<0.000000e+00> : vector<16x128xf32>
    %38 = tpu.matmul %37, %0, %cst_21 {dimension_numbers = #tpu.dot_dimension_numbers<[1], [0], [0], [1], [0, 0, 1, 1], [], []>} : vector<16x128xbf16>, vector<128x128xbf16>, vector<16x128xf32> -> vector<16x128xf32>
    %39 = vector.broadcast %2 : vector<1x128xf32> to vector<16x128xf32>
    %40 = arith.addf %38, %39 : vector<16x128xf32>
    %cst_22 = arith.constant 0.000000e+00 : f32
    %41 = vector.broadcast %cst_22 : f32 to vector<16x128xf32>
    %42 = arith.maximumf %40, %41 : vector<16x128xf32>
    %43 = arith.truncf %42 : vector<16x128xf32> to vector<16x128xbf16>
    %cst_23 = arith.constant dense<0.000000e+00> : vector<16x128xf32>
    %44 = tpu.matmul %43, %1, %cst_23 {dimension_numbers = #tpu.dot_dimension_numbers<[1], [0], [0], [1], [0, 0, 1, 1], [], []>} : vector<16x128xbf16>, vector<128x128xbf16>, vector<16x128xf32> -> vector<16x128xf32>
    %45 = vector.broadcast %3 : vector<1x128xf32> to vector<16x128xf32>
    %46 = arith.addf %44, %45 : vector<16x128xf32>
    %cst_24 = arith.constant 0.000000e+00 : f32
    %47 = vector.broadcast %cst_24 : f32 to vector<16x128xf32>
    %48 = arith.maximumf %46, %47 : vector<16x128xf32>
    %49 = arith.maximumf %34, %48 : vector<16x128xf32>
    %c3_i32 = arith.constant 3 : i32
    %50 = arith.index_cast %c3_i32 : i32 to index
    %c0_25 = arith.constant 0 : index
    %c0_26 = arith.constant 0 : index
    %51 = vector.load %arg1[%50, %c0_25, %c0_26] : memref<8x16x128xbf16, #tpu.memory_space<vmem>>, vector<1x16x128xbf16>
    %52 = vector.shape_cast %51 : vector<1x16x128xbf16> to vector<16x128xbf16>
    %cst_27 = arith.constant dense<0.000000e+00> : vector<16x128xf32>
    %53 = tpu.matmul %52, %0, %cst_27 {dimension_numbers = #tpu.dot_dimension_numbers<[1], [0], [0], [1], [0, 0, 1, 1], [], []>} : vector<16x128xbf16>, vector<128x128xbf16>, vector<16x128xf32> -> vector<16x128xf32>
    %54 = vector.broadcast %2 : vector<1x128xf32> to vector<16x128xf32>
    %55 = arith.addf %53, %54 : vector<16x128xf32>
    %cst_28 = arith.constant 0.000000e+00 : f32
    %56 = vector.broadcast %cst_28 : f32 to vector<16x128xf32>
    %57 = arith.maximumf %55, %56 : vector<16x128xf32>
    %58 = arith.truncf %57 : vector<16x128xf32> to vector<16x128xbf16>
    %cst_29 = arith.constant dense<0.000000e+00> : vector<16x128xf32>
    %59 = tpu.matmul %58, %1, %cst_29 {dimension_numbers = #tpu.dot_dimension_numbers<[1], [0], [0], [1], [0, 0, 1, 1], [], []>} : vector<16x128xbf16>, vector<128x128xbf16>, vector<16x128xf32> -> vector<16x128xf32>
    %60 = vector.broadcast %3 : vector<1x128xf32> to vector<16x128xf32>
    %61 = arith.addf %59, %60 : vector<16x128xf32>
    %cst_30 = arith.constant 0.000000e+00 : f32
    %62 = vector.broadcast %cst_30 : f32 to vector<16x128xf32>
    %63 = arith.maximumf %61, %62 : vector<16x128xf32>
    %64 = arith.maximumf %49, %63 : vector<16x128xf32>
    %c4_i32 = arith.constant 4 : i32
    %65 = arith.index_cast %c4_i32 : i32 to index
    %c0_31 = arith.constant 0 : index
    %c0_32 = arith.constant 0 : index
    %66 = vector.load %arg1[%65, %c0_31, %c0_32] : memref<8x16x128xbf16, #tpu.memory_space<vmem>>, vector<1x16x128xbf16>
    %67 = vector.shape_cast %66 : vector<1x16x128xbf16> to vector<16x128xbf16>
    %cst_33 = arith.constant dense<0.000000e+00> : vector<16x128xf32>
    %68 = tpu.matmul %67, %0, %cst_33 {dimension_numbers = #tpu.dot_dimension_numbers<[1], [0], [0], [1], [0, 0, 1, 1], [], []>} : vector<16x128xbf16>, vector<128x128xbf16>, vector<16x128xf32> -> vector<16x128xf32>
    %69 = vector.broadcast %2 : vector<1x128xf32> to vector<16x128xf32>
    %70 = arith.addf %68, %69 : vector<16x128xf32>
    %cst_34 = arith.constant 0.000000e+00 : f32
    %71 = vector.broadcast %cst_34 : f32 to vector<16x128xf32>
    %72 = arith.maximumf %70, %71 : vector<16x128xf32>
    %73 = arith.truncf %72 : vector<16x128xf32> to vector<16x128xbf16>
    %cst_35 = arith.constant dense<0.000000e+00> : vector<16x128xf32>
    %74 = tpu.matmul %73, %1, %cst_35 {dimension_numbers = #tpu.dot_dimension_numbers<[1], [0], [0], [1], [0, 0, 1, 1], [], []>} : vector<16x128xbf16>, vector<128x128xbf16>, vector<16x128xf32> -> vector<16x128xf32>
    %75 = vector.broadcast %3 : vector<1x128xf32> to vector<16x128xf32>
    %76 = arith.addf %74, %75 : vector<16x128xf32>
    %cst_36 = arith.constant 0.000000e+00 : f32
    %77 = vector.broadcast %cst_36 : f32 to vector<16x128xf32>
    %78 = arith.maximumf %76, %77 : vector<16x128xf32>
    %79 = arith.maximumf %64, %78 : vector<16x128xf32>
    %c5_i32 = arith.constant 5 : i32
    %80 = arith.index_cast %c5_i32 : i32 to index
    %c0_37 = arith.constant 0 : index
    %c0_38 = arith.constant 0 : index
    %81 = vector.load %arg1[%80, %c0_37, %c0_38] : memref<8x16x128xbf16, #tpu.memory_space<vmem>>, vector<1x16x128xbf16>
    %82 = vector.shape_cast %81 : vector<1x16x128xbf16> to vector<16x128xbf16>
    %cst_39 = arith.constant dense<0.000000e+00> : vector<16x128xf32>
    %83 = tpu.matmul %82, %0, %cst_39 {dimension_numbers = #tpu.dot_dimension_numbers<[1], [0], [0], [1], [0, 0, 1, 1], [], []>} : vector<16x128xbf16>, vector<128x128xbf16>, vector<16x128xf32> -> vector<16x128xf32>
    %84 = vector.broadcast %2 : vector<1x128xf32> to vector<16x128xf32>
    %85 = arith.addf %83, %84 : vector<16x128xf32>
    %cst_40 = arith.constant 0.000000e+00 : f32
    %86 = vector.broadcast %cst_40 : f32 to vector<16x128xf32>
    %87 = arith.maximumf %85, %86 : vector<16x128xf32>
    %88 = arith.truncf %87 : vector<16x128xf32> to vector<16x128xbf16>
    %cst_41 = arith.constant dense<0.000000e+00> : vector<16x128xf32>
    %89 = tpu.matmul %88, %1, %cst_41 {dimension_numbers = #tpu.dot_dimension_numbers<[1], [0], [0], [1], [0, 0, 1, 1], [], []>} : vector<16x128xbf16>, vector<128x128xbf16>, vector<16x128xf32> -> vector<16x128xf32>
    %90 = vector.broadcast %3 : vector<1x128xf32> to vector<16x128xf32>
    %91 = arith.addf %89, %90 : vector<16x128xf32>
    %cst_42 = arith.constant 0.000000e+00 : f32
    %92 = vector.broadcast %cst_42 : f32 to vector<16x128xf32>
    %93 = arith.maximumf %91, %92 : vector<16x128xf32>
    %94 = arith.maximumf %79, %93 : vector<16x128xf32>
    %c6_i32 = arith.constant 6 : i32
    %95 = arith.index_cast %c6_i32 : i32 to index
    %c0_43 = arith.constant 0 : index
    %c0_44 = arith.constant 0 : index
    %96 = vector.load %arg1[%95, %c0_43, %c0_44] : memref<8x16x128xbf16, #tpu.memory_space<vmem>>, vector<1x16x128xbf16>
    %97 = vector.shape_cast %96 : vector<1x16x128xbf16> to vector<16x128xbf16>
    %cst_45 = arith.constant dense<0.000000e+00> : vector<16x128xf32>
    %98 = tpu.matmul %97, %0, %cst_45 {dimension_numbers = #tpu.dot_dimension_numbers<[1], [0], [0], [1], [0, 0, 1, 1], [], []>} : vector<16x128xbf16>, vector<128x128xbf16>, vector<16x128xf32> -> vector<16x128xf32>
    %99 = vector.broadcast %2 : vector<1x128xf32> to vector<16x128xf32>
    %100 = arith.addf %98, %99 : vector<16x128xf32>
    %cst_46 = arith.constant 0.000000e+00 : f32
    %101 = vector.broadcast %cst_46 : f32 to vector<16x128xf32>
    %102 = arith.maximumf %100, %101 : vector<16x128xf32>
    %103 = arith.truncf %102 : vector<16x128xf32> to vector<16x128xbf16>
    %cst_47 = arith.constant dense<0.000000e+00> : vector<16x128xf32>
    %104 = tpu.matmul %103, %1, %cst_47 {dimension_numbers = #tpu.dot_dimension_numbers<[1], [0], [0], [1], [0, 0, 1, 1], [], []>} : vector<16x128xbf16>, vector<128x128xbf16>, vector<16x128xf32> -> vector<16x128xf32>
    %105 = vector.broadcast %3 : vector<1x128xf32> to vector<16x128xf32>
    %106 = arith.addf %104, %105 : vector<16x128xf32>
    %cst_48 = arith.constant 0.000000e+00 : f32
    %107 = vector.broadcast %cst_48 : f32 to vector<16x128xf32>
    %108 = arith.maximumf %106, %107 : vector<16x128xf32>
    %109 = arith.maximumf %94, %108 : vector<16x128xf32>
    %c7_i32 = arith.constant 7 : i32
    %110 = arith.index_cast %c7_i32 : i32 to index
    %c0_49 = arith.constant 0 : index
    %c0_50 = arith.constant 0 : index
    %111 = vector.load %arg1[%110, %c0_49, %c0_50] : memref<8x16x128xbf16, #tpu.memory_space<vmem>>, vector<1x16x128xbf16>
    %112 = vector.shape_cast %111 : vector<1x16x128xbf16> to vector<16x128xbf16>
    %cst_51 = arith.constant dense<0.000000e+00> : vector<16x128xf32>
    %113 = tpu.matmul %112, %0, %cst_51 {dimension_numbers = #tpu.dot_dimension_numbers<[1], [0], [0], [1], [0, 0, 1, 1], [], []>} : vector<16x128xbf16>, vector<128x128xbf16>, vector<16x128xf32> -> vector<16x128xf32>
    %114 = vector.broadcast %2 : vector<1x128xf32> to vector<16x128xf32>
    %115 = arith.addf %113, %114 : vector<16x128xf32>
    %cst_52 = arith.constant 0.000000e+00 : f32
    %116 = vector.broadcast %cst_52 : f32 to vector<16x128xf32>
    %117 = arith.maximumf %115, %116 : vector<16x128xf32>
    %118 = arith.truncf %117 : vector<16x128xf32> to vector<16x128xbf16>
    %cst_53 = arith.constant dense<0.000000e+00> : vector<16x128xf32>
    %119 = tpu.matmul %118, %1, %cst_53 {dimension_numbers = #tpu.dot_dimension_numbers<[1], [0], [0], [1], [0, 0, 1, 1], [], []>} : vector<16x128xbf16>, vector<128x128xbf16>, vector<16x128xf32> -> vector<16x128xf32>
    %120 = vector.broadcast %3 : vector<1x128xf32> to vector<16x128xf32>
    %121 = arith.addf %119, %120 : vector<16x128xf32>
    %cst_54 = arith.constant 0.000000e+00 : f32
    %122 = vector.broadcast %cst_54 : f32 to vector<16x128xf32>
    %123 = arith.maximumf %121, %122 : vector<16x128xf32>
    %124 = arith.maximumf %109, %123 : vector<16x128xf32>
    %c8_i32 = arith.constant 8 : i32
    %c0_55 = arith.constant 0 : index
    %c0_56 = arith.constant 0 : index
    %125 = vector.load %arg6[%c0_55, %c0_56] : memref<16x128xf32, #tpu.memory_space<vmem>>, vector<16x128xf32>
    tpu.vector_store %arg6[%c0_55, %c0_56], %124 {strides = array<i32>} : memref<16x128xf32, #tpu.memory_space<vmem>>, vector<16x128xf32>,
    return
  }
  func.func @transform_0(%arg0: i32) -> (i32, i32, i32) {
    %c0_i32 = arith.constant 0 : i32
    %c0_i32_0 = arith.constant 0 : i32
    %c0_i32_1 = arith.constant 0 : i32
    return %c0_i32, %arg0, %c0_i32_0 : i32, i32, i32
  }
  func.func @transform_1(%arg0: i32) -> (i32, i32) {
    %c0_i32 = arith.constant 0 : i32
    %c0_i32_0 = arith.constant 0 : i32
    %c0_i32_1 = arith.constant 0 : i32
    return %c0_i32, %c0_i32_0 : i32, i32
  }
  func.func @transform_2(%arg0: i32) -> (i32, i32) {
    %c0_i32 = arith.constant 0 : i32
    %c0_i32_0 = arith.constant 0 : i32
    %c0_i32_1 = arith.constant 0 : i32
    return %c0_i32, %c0_i32_0 : i32, i32
  }
  func.func @transform_3(%arg0: i32) -> (i32, i32) {
    %c0_i32 = arith.constant 0 : i32
    %c0_i32_0 = arith.constant 0 : i32
    %c0_i32_1 = arith.constant 0 : i32
    return %c0_i32, %c0_i32_0 : i32, i32
  }
  func.func @transform_4(%arg0: i32) -> (i32, i32) {
    %c0_i32 = arith.constant 0 : i32
    %c0_i32_0 = arith.constant 0 : i32
    %c0_i32_1 = arith.constant 0 : i32
    return %c0_i32, %c0_i32_0 : i32, i32
  }
  func.func @transform_5(%arg0: i32) -> (i32, i32) {
    %c0_i32 = arith.constant 0 : i32
    %c0_i32_0 = arith.constant 0 : i32
    return %arg0, %c0_i32 : i32, i32
  }
}

</mosaic_0001>

<bundles_post_ra>
// kernel: tpu_custom_call.1
= control target key start
LH: loop header
LB: loop body
LE: loop exit
PB: predicated region body
PF: predicated region fallthrough
CT: control target
= control target key end

     0   :  { %10 = vsyncpa [#allocation3], 0  ;;  %s2030_s0 = inlined_call_operand.hbm [shape: bf16[8,16,128], index: 0, kind: input, shape index: {}]   ;;  %s2031_s1 = inlined_call_operand.hbm [shape: bf16[128,128], index: 1, kind: input, shape index: {}]   ;;  %s2032_s2 = inlined_call_operand.vmem [shape: f32[1,128], index: 2, kind: input, shape index: {}]   ;;  %s2033_s3 = inlined_call_operand.hbm [shape: bf16[128,128], index: 3, kind: input, shape index: {}]   ;;  %s2034_s4 = inlined_call_operand.vmem [shape: f32[1,128], index: 4, kind: input, shape index: {}]   ;;  %s2035_s5 = inlined_call_operand.hbm [shape: f32[16,128], index: 5, kind: output, shape index: {}]  }
   0x1   :  { %11 = vsyncpa [#allocation6], 0 }
   0x2   :  { %12 = vsyncpa [#allocation4], 0  ;;  %s1616_s18 = smov [#allocation5]   ;;  %s1617_s20 = smov [#allocation2]  }
   0x3   :  { %s30_s19 = sshll.u32 %s1616_s18, 4  ;;  %s18_s21 = sshll.u32 %s1617_s20, 4  ;;  %s31_s19 = int_to_ptr.vmem [resolvable:$true] %s30_s19  ;;  %s19_s21 = int_to_ptr.vmem [resolvable:$true] %s18_s21 }
   0x4   :  { %s1538_s22 = scalar_lea.vmem %s31_s19, 1024  ;;  %p1543_p1 = scmp.lt.s32.totalorder %s31_s19, %s31_s19 }
   0x5   :  { %p1539_p0 = scmp.ne.s32.totalorder %s31_s19, %s1538_s22  ;;  %p1544_p2 = scmp.lt.s32.totalorder %s1538_s22, %s1538_s22 }
   0x7   :  { %p1545_p3 = por %p1544_p2, %p1543_p1 }
   0x9   :  { %p1546_p4 = pnand %p1545_p3, %p1539_p0 }
   0xb   :  { %1549 = shalt.err (!%p1546_p4)
}
   0xc   :  { %s1618_s23 = smov 64   ;;  %s1619_s24 = smov 4  }
   0xd   :  { %36 = dma.hbm_to_vmem [thread:$0]  %s2031_s1, 1024, %s31_s19, [#allocation6], %s1618_s23, %s1618_s23, %s1619_s24  }
   0xe   :  { %s1558_s27 = scalar_lea.vmem %s19_s21, 1024  ;;  %p1563_p6 = scmp.lt.s32.totalorder %s19_s21, %s19_s21 }
   0xf   :  { %p1559_p5 = scmp.ne.s32.totalorder %s19_s21, %s1558_s27  ;;  %p1564_p7 = scmp.lt.s32.totalorder %s1558_s27, %s1558_s27 }
  0x11   :  { %p1565_p8 = por %p1564_p7, %p1563_p6 }
  0x13   :  { %p1566_p9 = pnand %p1565_p8, %p1559_p5 }
  0x15   :  { %1569 = shalt.err (!%p1566_p9)
}
  0x16   :  { %24 = dma.hbm_to_vmem [thread:$0]  %s2030_s0, 1024, %s19_s21, [#allocation3], %s1618_s23, %s1618_s23, %s1619_s24  }
  0x17   :  { %s1620_s30 = smov [#allocation7]  }
  0x18   :  { %s44_s6 = sshll.u32 %s1620_s30, 4  ;;  %s45_s6 = int_to_ptr.vmem [resolvable:$true] %s44_s6 }
  0x19   :  { %s1578_s7 = scalar_lea.vmem %s45_s6, 1024  ;;  %p1583_p11 = scmp.lt.s32.totalorder %s45_s6, %s45_s6 }
  0x1a   :  { %p1579_p10 = scmp.ne.s32.totalorder %s45_s6, %s1578_s7  ;;  %p1584_p12 = scmp.lt.s32.totalorder %s1578_s7, %s1578_s7 }
  0x1c   :  { %p1585_p13 = por %p1584_p12, %p1583_p11 }
  0x1e   :  { %p1586_p0 = pnand %p1585_p13, %p1579_p10 }
  0x20   :  { %1589 = shalt.err (!%p1586_p0)
}
  0x21   :  { %50 = dma.hbm_to_vmem [thread:$0]  %s2033_s3, 1024, %s45_s6, [#allocation6], %s1618_s23, %s1618_s23, %s1619_s24  }
  0x22   :  { %1610 = dma.done.wait [#allocation3], 1024  }
  0x23   :  { %1611 = vsyncadd [#allocation3], 4294966272 }
  0x24   :  { %1612 = dma.done.wait [#allocation6], 2048  }
  0x25   :  { %1613 = vsyncadd [#allocation6], 4294965248  ;;  %v1621_v0 = vmov 0.0   ;;  %vm1622_vm0 = vmmov 0   ;;  %v1671_v1 = vld [vmem:[#allocation5 + $0x38] sm:$0xff]   ;;  %v1674_v2 = vld [vmem:[#allocation5 + $0x30] sm:$0xff]  }
  0x26   :  { %1176 = vmatprep.subr.bf16.mxu0 %v1621_v0  ;;  %1192 = vmatprep.mubr.msk.bf16.mxu0 %vm1622_vm0, %v1621_v0  ;;  %v1678_v3 = vld [vmem:[#allocation5 + $0x28] sm:$0xff]   ;;  %v1682_v4 = vld [vmem:[#allocation5 + $0x20] sm:$0xff]   ;;  %v1685_v5 = vld [vmem:[#allocation5 + $0x18] sm:$0xff]  }
  0x27   :  { %1196 = vmatprep.subr.bf16.mxu1 %v1621_v0  ;;  %1212 = vmatprep.mubr.msk.bf16.mxu1 %vm1622_vm0, %v1621_v0  ;;  %v1689_v6 = vld [vmem:[#allocation5 + $0x10] sm:$0xff]   ;;  %v1694_v7 = vld [vmem:[#allocation5 + $0x8] sm:$0xff]   ;;  %v1698_v8 = vld [vmem:[#allocation5] sm:$0xff]  }
  0x28   :  { %1177 = vmatpush3.bf16.msra.mxu0 %v1671_v1  ;;  %v1514_v9 = vld [vmem:[#allocation2] sm:$0xff]   ;;  %v1515_v10 = vld [vmem:[#allocation2 + $0x8] sm:$0xff]   ;;  %v1728_v11 = vld [vmem:[#allocation7 + $0x38] sm:$0xff]  }
  0x29   :  { %1178 = vmatprep.subr.bf16.mxu0 %v1621_v0  ;;  %1197 = vmatpush3.bf16.msra.mxu1 %v1728_v11  ;;  %v1734_v12 = vld [vmem:[#allocation7 + $0x30] sm:$0xff]   ;;  %v1740_v13 = vld [vmem:[#allocation7 + $0x28] sm:$0xff]   ;;  %v1746_v14 = vld [vmem:[#allocation7 + $0x20] sm:$0xff]  }
  0x2a   :  { %1198 = vmatprep.subr.bf16.mxu1 %v1621_v0  ;;  %v1752_v15 = vld [vmem:[#allocation7 + $0x18] sm:$0xff]   ;;  %v1516_v16 = vld [vmem:[#allocation2 + $0x10] sm:$0xff]   ;;  %v1767_v18 = vld [vmem:[#allocation7 + $0x8] sm:$0xff]  }
  0x2b   :  { %v1759_v17 = vld [vmem:[#allocation7 + $0x10] sm:$0xff]   ;;  %v1773_v19 = vld [vmem:[#allocation7] sm:$0xff]   ;;  %v1517_v20 = vld [vmem:[#allocation2 + $0x18] sm:$0xff]  }
  0x2c   :  { %1179 = vmatpush3.bf16.msra.mxu0 %v1674_v2  ;;  %v1518_v21 = vld [vmem:[#allocation2 + $0x20] sm:$0xff]   ;;  %v1519_v22 = vld [vmem:[#allocation2 + $0x28] sm:$0xff]   ;;  %v1526_v23 = vld [vmem:[#allocation2 + $0x30] sm:$0xff]  }
  0x2d   :  { %1180 = vmatprep.subr.bf16.mxu0 %v1621_v0  ;;  %1199 = vmatpush3.bf16.msra.mxu1 %v1734_v12  ;;  %v1846_v24 = vld [vmem:[%s2032_s2] ss:$0 sm:$0xff]  ;;  %v1529_v34 = vld [vmem:[#allocation2 + $0x38] sm:$0xff]  }
  0x2e   :  { %1200 = vmatprep.subr.bf16.mxu1 %v1621_v0 }
  0x30   :  { %1181 = vmatpush3.bf16.msra.mxu0 %v1678_v3 }
  0x31   :  { %1182 = vmatprep.subr.bf16.mxu0 %v1621_v0  ;;  %1201 = vmatpush3.bf16.msra.mxu1 %v1740_v13 }
  0x32   :  { %1202 = vmatprep.subr.bf16.mxu1 %v1621_v0 }
  0x34   :  { %1183 = vmatpush3.bf16.msra.mxu0 %v1682_v4 }
  0x35   :  { %1184 = vmatprep.subr.bf16.mxu0 %v1621_v0  ;;  %1203 = vmatpush3.bf16.msra.mxu1 %v1746_v14 }
  0x36   :  { %1204 = vmatprep.subr.bf16.mxu1 %v1621_v0 }
  0x38   :  { %1185 = vmatpush3.bf16.msra.mxu0 %v1685_v5 }
  0x39   :  { %1186 = vmatprep.subr.bf16.mxu0 %v1621_v0  ;;  %1205 = vmatpush3.bf16.msra.mxu1 %v1752_v15 }
  0x3a   :  { %1206 = vmatprep.subr.bf16.mxu1 %v1621_v0 }
  0x3c   :  { %1187 = vmatpush3.bf16.msra.mxu0 %v1689_v6 }
  0x3d   :  { %1188 = vmatprep.subr.bf16.mxu0 %v1621_v0  ;;  %1207 = vmatpush3.bf16.msra.mxu1 %v1759_v17 }
  0x3e   :  { %1208 = vmatprep.subr.bf16.mxu1 %v1621_v0 }
  0x40   :  { %1189 = vmatpush3.bf16.msra.mxu0 %v1694_v7 }
  0x41   :  { %1190 = vmatprep.subr.bf16.mxu0 %v1621_v0  ;;  %1209 = vmatpush3.bf16.msra.mxu1 %v1767_v18 }
  0x42   :  { %1210 = vmatprep.subr.bf16.mxu1 %v1621_v0 }
  0x44   :  { %1191 = vmatpush3.bf16.msra.mxu0 %v1698_v8 }
  0x45   :  { %1216 = vmatprep.subr.bf16.mxu0 %v1621_v0  ;;  %1211 = vmatpush3.bf16.msra.mxu1 %v1773_v19 }
  0x46   :  { %1236 = vmatprep.subr.bf16.mxu1 %v1621_v0 }
  0x47   :  { %1193 = vmatmul.mubr.bf16.vlgmr.msra.gmra.mxu0 %v1514_v9 }
  0x48   :  { %1217 = vmatpush3.bf16.msra.mxu0 %v1671_v1  ;;  %1232 = vmatprep.mubr.msk.bf16.mxu0 %vm1622_vm0, %v1621_v0 }
  0x49   :  { %1218 = vmatprep.subr.bf16.mxu0 %v1621_v0 }
  0x4c   :  { %1219 = vmatpush3.bf16.msra.mxu0 %v1674_v2 }
  0x4d   :  { %1220 = vmatprep.subr.bf16.mxu0 %v1621_v0 }
  0x50   :  { %1221 = vmatpush3.bf16.msra.mxu0 %v1678_v3 }
  0x51   :  { %1222 = vmatprep.subr.bf16.mxu0 %v1621_v0 }
  0x54   :  { %1223 = vmatpush3.bf16.msra.mxu0 %v1682_v4 }
  0x55   :  { %1224 = vmatprep.subr.bf16.mxu0 %v1621_v0 }
  0x58   :  { %1225 = vmatpush3.bf16.msra.mxu0 %v1685_v5 }
  0x59   :  { %1226 = vmatprep.subr.bf16.mxu0 %v1621_v0 }
  0x5c   :  { %1227 = vmatpush3.bf16.msra.mxu0 %v1689_v6 }
  0x5d   :  { %1228 = vmatprep.subr.bf16.mxu0 %v1621_v0 }
  0x60   :  { %1229 = vmatpush3.bf16.msra.mxu0 %v1694_v7 }
  0x61   :  { %1230 = vmatprep.subr.bf16.mxu0 %v1621_v0 }
  0x64   :  { %1231 = vmatpush3.bf16.msra.mxu0 %v1698_v8 }
  0x65   :  { %1256 = vmatprep.subr.bf16.mxu0 %v1621_v0 }
  0x67   :  { %1233 = vmatmul.mubr.bf16.vlgmr.msra.gmra.mxu0 %v1515_v10 }
  0x68   :  { %1257 = vmatpush3.bf16.msra.mxu0 %v1671_v1  ;;  %1272 = vmatprep.mubr.msk.bf16.mxu0 %vm1622_vm0, %v1621_v0 }
  0x69   :  { %1258 = vmatprep.subr.bf16.mxu0 %v1621_v0 }
  0x6c   :  { %1259 = vmatpush3.bf16.msra.mxu0 %v1674_v2 }
  0x6d   :  { %1260 = vmatprep.subr.bf16.mxu0 %v1621_v0 }
  0x70   :  { %1261 = vmatpush3.bf16.msra.mxu0 %v1678_v3 }
  0x71   :  { %1262 = vmatprep.subr.bf16.mxu0 %v1621_v0 }
  0x74   :  { %1263 = vmatpush3.bf16.msra.mxu0 %v1682_v4 }
  0x75   :  { %1264 = vmatprep.subr.bf16.mxu0 %v1621_v0 }
  0x78   :  { %1265 = vmatpush3.bf16.msra.mxu0 %v1685_v5 }
  0x79   :  { %1266 = vmatprep.subr.bf16.mxu0 %v1621_v0 }
  0x7c   :  { %1267 = vmatpush3.bf16.msra.mxu0 %v1689_v6 }
  0x7d   :  { %1268 = vmatprep.subr.bf16.mxu0 %v1621_v0 }
  0x80   :  { %1269 = vmatpush3.bf16.msra.mxu0 %v1694_v7 }
  0x81   :  { %1270 = vmatprep.subr.bf16.mxu0 %v1621_v0 }
  0x84   :  { %1271 = vmatpush3.bf16.msra.mxu0 %v1698_v8 }
  0x85   :  { %1296 = vmatprep.subr.bf16.mxu0 %v1621_v0 }
  0x87   :  { %1273 = vmatmul.mubr.bf16.vlgmr.msra.gmra.mxu0 %v1516_v16 }
  0x88   :  { %1297 = vmatpush3.bf16.msra.mxu0 %v1671_v1  ;;  %1312 = vmatprep.mubr.msk.bf16.mxu0 %vm1622_vm0, %v1621_v0 }
  0x89   :  { %1298 = vmatprep.subr.bf16.mxu0 %v1621_v0 }
  0x8c   :  { %1299 = vmatpush3.bf16.msra.mxu0 %v1674_v2 }
  0x8d   :  { %1300 = vmatprep.subr.bf16.mxu0 %v1621_v0 }
  0x90   :  { %1301 = vmatpush3.bf16.msra.mxu0 %v1678_v3 }
  0x91   :  { %1302 = vmatprep.subr.bf16.mxu0 %v1621_v0 }
  0x94   :  { %1303 = vmatpush3.bf16.msra.mxu0 %v1682_v4 }
  0x95   :  { %1304 = vmatprep.subr.bf16.mxu0 %v1621_v0 }
  0x98   :  { %1305 = vmatpush3.bf16.msra.mxu0 %v1685_v5 }
  0x99   :  { %1306 = vmatprep.subr.bf16.mxu0 %v1621_v0 }
  0x9c   :  { %1307 = vmatpush3.bf16.msra.mxu0 %v1689_v6 }
  0x9d   :  { %1308 = vmatprep.subr.bf16.mxu0 %v1621_v0 }
  0xa0   :  { %1309 = vmatpush3.bf16.msra.mxu0 %v1694_v7 }
  0xa1   :  { %1310 = vmatprep.subr.bf16.mxu0 %v1621_v0 }
  0xa4   :  { %1311 = vmatpush3.bf16.msra.mxu0 %v1698_v8 }
  0xa5   :  { %1336 = vmatprep.subr.bf16.mxu0 %v1621_v0 }
  0xa7   :  { %1313 = vmatmul.mubr.bf16.vlgmr.msra.gmra.mxu0 %v1517_v20 }
  0xa8   :  { %1337 = vmatpush3.bf16.msra.mxu0 %v1671_v1  ;;  %1352 = vmatprep.mubr.msk.bf16.mxu0 %vm1622_vm0, %v1621_v0 }
  0xa9   :  { %1338 = vmatprep.subr.bf16.mxu0 %v1621_v0 }
  0xac   :  { %1339 = vmatpush3.bf16.msra.mxu0 %v1674_v2 }
  0xad   :  { %1340 = vmatprep.subr.bf16.mxu0 %v1621_v0 }
  0xb0   :  { %1341 = vmatpush3.bf16.msra.mxu0 %v1678_v3 }
  0xb1   :  { %1342 = vmatprep.subr.bf16.mxu0 %v1621_v0 }
  0xb4   :  { %1343 = vmatpush3.bf16.msra.mxu0 %v1682_v4 }
  0xb5   :  { %1344 = vmatprep.subr.bf16.mxu0 %v1621_v0 }
  0xb8   :  { %1345 = vmatpush3.bf16.msra.mxu0 %v1685_v5 }
  0xb9   :  { %1346 = vmatprep.subr.bf16.mxu0 %v1621_v0 }
  0xbc   :  { %1347 = vmatpush3.bf16.msra.mxu0 %v1689_v6 }
  0xbd   :  { %1348 = vmatprep.subr.bf16.mxu0 %v1621_v0 }
  0xc0   :  { %1349 = vmatpush3.bf16.msra.mxu0 %v1694_v7 }
  0xc1   :  { %1350 = vmatprep.subr.bf16.mxu0 %v1621_v0 }
  0xc4   :  { %1351 = vmatpush3.bf16.msra.mxu0 %v1698_v8 }
  0xc5   :  { %1376 = vmatprep.subr.bf16.mxu0 %v1621_v0 }
  0xc7   :  { %1353 = vmatmul.mubr.bf16.vlgmr.msra.gmra.mxu0 %v1518_v21 }
  0xc8   :  { %1377 = vmatpush3.bf16.msra.mxu0 %v1671_v1  ;;  %1392 = vmatprep.mubr.msk.bf16.mxu0 %vm1622_vm0, %v1621_v0 }
  0xc9   :  { %1378 = vmatprep.subr.bf16.mxu0 %v1621_v0 }
  0xcc   :  { %1379 = vmatpush3.bf16.msra.mxu0 %v1674_v2 }
  0xcd   :  { %1380 = vmatprep.subr.bf16.mxu0 %v1621_v0 }
  0xd0   :  { %1381 = vmatpush3.bf16.msra.mxu0 %v1678_v3 }
  0xd1   :  { %1382 = vmatprep.subr.bf16.mxu0 %v1621_v0 }
  0xd4   :  { %1383 = vmatpush3.bf16.msra.mxu0 %v1682_v4 }
  0xd5   :  { %1384 = vmatprep.subr.bf16.mxu0 %v1621_v0 }
  0xd8   :  { %1385 = vmatpush3.bf16.msra.mxu0 %v1685_v5 }
  0xd9   :  { %1386 = vmatprep.subr.bf16.mxu0 %v1621_v0 }
  0xdc   :  { %1387 = vmatpush3.bf16.msra.mxu0 %v1689_v6 }
  0xdd   :  { %1388 = vmatprep.subr.bf16.mxu0 %v1621_v0 }
  0xe0   :  { %1389 = vmatpush3.bf16.msra.mxu0 %v1694_v7 }
  0xe1   :  { %1390 = vmatprep.subr.bf16.mxu0 %v1621_v0 }
  0xe4   :  { %1391 = vmatpush3.bf16.msra.mxu0 %v1698_v8 }
  0xe5   :  { %1416 = vmatprep.subr.bf16.mxu0 %v1621_v0 }
  0xe7   :  { %1393 = vmatmul.mubr.bf16.vlgmr.msra.gmra.mxu0 %v1519_v22 }
  0xe8   :  { %1417 = vmatpush3.bf16.msra.mxu0 %v1671_v1  ;;  %1432 = vmatprep.mubr.msk.bf16.mxu0 %vm1622_vm0, %v1621_v0 }
  0xe9   :  { %1418 = vmatprep.subr.bf16.mxu0 %v1621_v0 }
  0xec   :  { %1419 = vmatpush3.bf16.msra.mxu0 %v1674_v2 }
  0xed   :  { %1420 = vmatprep.subr.bf16.mxu0 %v1621_v0 }
  0xf0   :  { %1421 = vmatpush3.bf16.msra.mxu0 %v1678_v3 }
  0xf1   :  { %1422 = vmatprep.subr.bf16.mxu0 %v1621_v0 }
  0xf4   :  { %1423 = vmatpush3.bf16.msra.mxu0 %v1682_v4 }
  0xf5   :  { %1424 = vmatprep.subr.bf16.mxu0 %v1621_v0 }
  0xf8   :  { %1425 = vmatpush3.bf16.msra.mxu0 %v1685_v5 }
  0xf9   :  { %1426 = vmatprep.subr.bf16.mxu0 %v1621_v0 }
  0xfc   :  { %1427 = vmatpush3.bf16.msra.mxu0 %v1689_v6 }
  0xfd   :  { %1428 = vmatprep.subr.bf16.mxu0 %v1621_v0 }
 0x100   :  { %1429 = vmatpush3.bf16.msra.mxu0 %v1694_v7 }
 0x101   :  { %1430 = vmatprep.subr.bf16.mxu0 %v1621_v0 }
 0x104   :  { %1431 = vmatpush3.bf16.msra.mxu0 %v1698_v8 }
 0x105   :  { %1456 = vmatprep.subr.bf16.mxu0 %v1621_v0 }
 0x107   :  { %v193_v25 = vpop.f32.mrf.mxu0  ;;  %1433 = vmatmul.mubr.bf16.vlgmr.msra.gmra.mxu0 %v1526_v23 }
 0x108   :  { %1457 = vmatpush3.bf16.msra.mxu0 %v1671_v1  ;;  %1472 = vmatprep.mubr.msk.bf16.mxu0 %vm1622_vm0, %v1621_v0  ;;  %v194_v27 = vadd.f32 %v1846_v24, %v193_v25 }
 0x109   :  { %v1194_v26 = vpop.f32.mrf.mxu0  ;;  %1458 = vmatprep.subr.bf16.mxu0 %v1621_v0 }
 0x10a   :  { %v200_v31 = vmax.f32 %v194_v27, 0.0 }
 0x10b   :  { %v196_v28 = vpop.f32.mrf.mxu0 }
 0x10c   :  { %v197_v29 = vadd.f32 %v1846_v24, %v196_v28  ;;  %1459 = vmatpush3.bf16.msra.mxu0 %v1674_v2 }
 0x10d   :  { %v1195_v30 = vpop.f32.mrf.mxu0  ;;  %1460 = vmatprep.subr.bf16.mxu0 %v1621_v0 }
 0x10e   :  { %v201_v32 = vmax.f32 %v197_v29, 0.0 }
 0x110   :  { %v202_v33 = vpack.c.bf16 %v201_v32, %v200_v31  ;;  %1461 = vmatpush3.bf16.msra.mxu0 %v1678_v3 }
 0x111   :  { %1462 = vmatprep.subr.bf16.mxu0 %v1621_v0 }
 0x112   :  { %1213 = vmatmul.mubr.bf16.vlgmr.msra.gmra.mxu1 %v202_v33 }
 0x113   :  { %1237 = vmatpush3.bf16.msra.mxu1 %v1728_v11  ;;  %1252 = vmatprep.mubr.msk.bf16.mxu1 %vm1622_vm0, %v1621_v0 }
 0x114   :  { %1463 = vmatpush3.bf16.msra.mxu0 %v1682_v4  ;;  %1238 = vmatprep.subr.bf16.mxu1 %v1621_v0 }
 0x115   :  { %1464 = vmatprep.subr.bf16.mxu0 %v1621_v0 }
 0x117   :  { %1239 = vmatpush3.bf16.msra.mxu1 %v1734_v12 }
 0x118   :  { %1465 = vmatpush3.bf16.msra.mxu0 %v1685_v5  ;;  %1240 = vmatprep.subr.bf16.mxu1 %v1621_v0 }
 0x119   :  { %1466 = vmatprep.subr.bf16.mxu0 %v1621_v0 }
 0x11b   :  { %1241 = vmatpush3.bf16.msra.mxu1 %v1740_v13 }
 0x11c   :  { %1467 = vmatpush3.bf16.msra.mxu0 %v1689_v6  ;;  %1242 = vmatprep.subr.bf16.mxu1 %v1621_v0 }
 0x11d   :  { %1468 = vmatprep.subr.bf16.mxu0 %v1621_v0 }
 0x11f   :  { %1243 = vmatpush3.bf16.msra.mxu1 %v1746_v14 }
 0x120   :  { %1469 = vmatpush3.bf16.msra.mxu0 %v1694_v7  ;;  %1244 = vmatprep.subr.bf16.mxu1 %v1621_v0 }
 0x121   :  { %1470 = vmatprep.subr.bf16.mxu0 %v1621_v0 }
 0x123   :  { %1245 = vmatpush3.bf16.msra.mxu1 %v1752_v15 }
 0x124   :  { %1471 = vmatpush3.bf16.msra.mxu0 %v1698_v8  ;;  %1246 = vmatprep.subr.bf16.mxu1 %v1621_v0 }
 0x127   :  { %v343_v35 = vpop.f32.mrf.mxu0  ;;  %1247 = vmatpush3.bf16.msra.mxu1 %v1759_v17  ;;  %1473 = vmatmul.mubr.bf16.vlgmr.msra.gmra.mxu0 %v1529_v34 }
 0x128   :  { %1248 = vmatprep.subr.bf16.mxu1 %v1621_v0  ;;  %v344_v37 = vadd.f32 %v1846_v24, %v343_v35 }
 0x129   :  { %v1234_v36 = vpop.f32.mrf.mxu0 }
 0x12a   :  { %v350_v41 = vmax.f32 %v344_v37, 0.0 }
 0x12b   :  { %v346_v38 = vpop.f32.mrf.mxu0  ;;  %1249 = vmatpush3.bf16.msra.mxu1 %v1767_v18 }
 0x12c   :  { %v347_v39 = vadd.f32 %v1846_v24, %v346_v38  ;;  %1250 = vmatprep.subr.bf16.mxu1 %v1621_v0 }
 0x12d   :  { %v1235_v40 = vpop.f32.mrf.mxu0 }
 0x12e   :  { %v351_v42 = vmax.f32 %v347_v39, 0.0 }
 0x12f   :  { %1251 = vmatpush3.bf16.msra.mxu1 %v1773_v19 }
 0x130   :  { %v352_v43 = vpack.c.bf16 %v351_v42, %v350_v41  ;;  %1276 = vmatprep.subr.bf16.mxu1 %v1621_v0 }
 0x132   :  { %1253 = vmatmul.mubr.bf16.vlgmr.msra.gmra.mxu1 %v352_v43 }
 0x133   :  { %1277 = vmatpush3.bf16.msra.mxu1 %v1728_v11  ;;  %1292 = vmatprep.mubr.msk.bf16.mxu1 %vm1622_vm0, %v1621_v0 }
 0x134   :  { %1278 = vmatprep.subr.bf16.mxu1 %v1621_v0 }
 0x137   :  { %1279 = vmatpush3.bf16.msra.mxu1 %v1734_v12 }
 0x138   :  { %1280 = vmatprep.subr.bf16.mxu1 %v1621_v0 }
 0x13b   :  { %1281 = vmatpush3.bf16.msra.mxu1 %v1740_v13 }
 0x13c   :  { %1282 = vmatprep.subr.bf16.mxu1 %v1621_v0 }
 0x13f   :  { %1283 = vmatpush3.bf16.msra.mxu1 %v1746_v14 }
 0x140   :  { %1284 = vmatprep.subr.bf16.mxu1 %v1621_v0 }
 0x143   :  { %1285 = vmatpush3.bf16.msra.mxu1 %v1752_v15 }
 0x144   :  { %1286 = vmatprep.subr.bf16.mxu1 %v1621_v0 }
 0x147   :  { %v441_v44 = vpop.f32.mrf.mxu0  ;;  %1287 = vmatpush3.bf16.msra.mxu1 %v1759_v17 }
 0x148   :  { %1288 = vmatprep.subr.bf16.mxu1 %v1621_v0  ;;  %v442_v46 = vadd.f32 %v1846_v24, %v441_v44 }
 0x149   :  { %v1274_v45 = vpop.f32.mrf.mxu0 }
 0x14a   :  { %v448_v50 = vmax.f32 %v442_v46, 0.0 }
 0x14b   :  { %v444_v47 = vpop.f32.mrf.mxu0  ;;  %1289 = vmatpush3.bf16.msra.mxu1 %v1767_v18 }
 0x14c   :  { %v445_v48 = vadd.f32 %v1846_v24, %v444_v47  ;;  %1290 = vmatprep.subr.bf16.mxu1 %v1621_v0 }
 0x14d   :  { %v1275_v49 = vpop.f32.mrf.mxu0 }
 0x14e   :  { %v449_v51 = vmax.f32 %v445_v48, 0.0 }
 0x14f   :  { %1291 = vmatpush3.bf16.msra.mxu1 %v1773_v19 }
 0x150   :  { %v450_v52 = vpack.c.bf16 %v449_v51, %v448_v50  ;;  %1316 = vmatprep.subr.bf16.mxu1 %v1621_v0 }
 0x152   :  { %1293 = vmatmul.mubr.bf16.vlgmr.msra.gmra.mxu1 %v450_v52 }
 0x153   :  { %1317 = vmatpush3.bf16.msra.mxu1 %v1728_v11  ;;  %1332 = vmatprep.mubr.msk.bf16.mxu1 %vm1622_vm0, %v1621_v0 }
 0x154   :  { %1318 = vmatprep.subr.bf16.mxu1 %v1621_v0 }
 0x157   :  { %1319 = vmatpush3.bf16.msra.mxu1 %v1734_v12 }
 0x158   :  { %1320 = vmatprep.subr.bf16.mxu1 %v1621_v0 }
 0x15b   :  { %1321 = vmatpush3.bf16.msra.mxu1 %v1740_v13 }
 0x15c   :  { %1322 = vmatprep.subr.bf16.mxu1 %v1621_v0 }
 0x15f   :  { %1323 = vmatpush3.bf16.msra.mxu1 %v1746_v14 }
 0x160   :  { %1324 = vmatprep.subr.bf16.mxu1 %v1621_v0 }
 0x163   :  { %1325 = vmatpush3.bf16.msra.mxu1 %v1752_v15 }
 0x164   :  { %1326 = vmatprep.subr.bf16.mxu1 %v1621_v0 }
 0x167   :  { %v539_v53 = vpop.f32.mrf.mxu0  ;;  %1327 = vmatpush3.bf16.msra.mxu1 %v1759_v17 }
 0x168   :  { %1328 = vmatprep.subr.bf16.mxu1 %v1621_v0  ;;  %v540_v55 = vadd.f32 %v1846_v24, %v539_v53 }
 0x169   :  { %v1314_v54 = vpop.f32.mrf.mxu0 }
 0x16a   :  { %v546_v59 = vmax.f32 %v540_v55, 0.0 }
 0x16b   :  { %v542_v56 = vpop.f32.mrf.mxu0  ;;  %1329 = vmatpush3.bf16.msra.mxu1 %v1767_v18 }
 0x16c   :  { %v543_v57 = vadd.f32 %v1846_v24, %v542_v56  ;;  %1330 = vmatprep.subr.bf16.mxu1 %v1621_v0 }
 0x16d   :  { %v1315_v58 = vpop.f32.mrf.mxu0 }
 0x16e   :  { %v547_v60 = vmax.f32 %v543_v57, 0.0 }
 0x16f   :  { %1331 = vmatpush3.bf16.msra.mxu1 %v1773_v19 }
 0x170   :  { %v548_v61 = vpack.c.bf16 %v547_v60, %v546_v59  ;;  %1356 = vmatprep.subr.bf16.mxu1 %v1621_v0 }
 0x172   :  { %1333 = vmatmul.mubr.bf16.vlgmr.msra.gmra.mxu1 %v548_v61 }
 0x173   :  { %1357 = vmatpush3.bf16.msra.mxu1 %v1728_v11  ;;  %1372 = vmatprep.mubr.msk.bf16.mxu1 %vm1622_vm0, %v1621_v0 }
 0x174   :  { %1358 = vmatprep.subr.bf16.mxu1 %v1621_v0 }
 0x177   :  { %1359 = vmatpush3.bf16.msra.mxu1 %v1734_v12 }
 0x178   :  { %1360 = vmatprep.subr.bf16.mxu1 %v1621_v0 }
 0x17b   :  { %1361 = vmatpush3.bf16.msra.mxu1 %v1740_v13 }
 0x17c   :  { %1362 = vmatprep.subr.bf16.mxu1 %v1621_v0 }
 0x17f   :  { %1363 = vmatpush3.bf16.msra.mxu1 %v1746_v14 }
 0x180   :  { %1364 = vmatprep.subr.bf16.mxu1 %v1621_v0 }
 0x183   :  { %1365 = vmatpush3.bf16.msra.mxu1 %v1752_v15 }
 0x184   :  { %1366 = vmatprep.subr.bf16.mxu1 %v1621_v0 }
 0x187   :  { %v637_v62 = vpop.f32.mrf.mxu0  ;;  %1367 = vmatpush3.bf16.msra.mxu1 %v1759_v17 }
 0x188   :  { %1368 = vmatprep.subr.bf16.mxu1 %v1621_v0  ;;  %v638_v1 = vadd.f32 %v1846_v24, %v637_v62 }
 0x189   :  { %v1354_v63 = vpop.f32.mrf.mxu0 }
 0x18a   :  { %v644_v5 = vmax.f32 %v638_v1, 0.0 }
 0x18b   :  { %v640_v2 = vpop.f32.mrf.mxu0  ;;  %1369 = vmatpush3.bf16.msra.mxu1 %v1767_v18 }
 0x18c   :  { %v641_v3 = vadd.f32 %v1846_v24, %v640_v2  ;;  %1370 = vmatprep.subr.bf16.mxu1 %v1621_v0 }
 0x18d   :  { %v1355_v4 = vpop.f32.mrf.mxu0 }
 0x18e   :  { %v645_v6 = vmax.f32 %v641_v3, 0.0 }
 0x18f   :  { %1371 = vmatpush3.bf16.msra.mxu1 %v1773_v19 }
 0x190   :  { %v646_v7 = vpack.c.bf16 %v645_v6, %v644_v5  ;;  %1396 = vmatprep.subr.bf16.mxu1 %v1621_v0 }
 0x192   :  { %1373 = vmatmul.mubr.bf16.vlgmr.msra.gmra.mxu1 %v646_v7 }
 0x193   :  { %1397 = vmatpush3.bf16.msra.mxu1 %v1728_v11  ;;  %1412 = vmatprep.mubr.msk.bf16.mxu1 %vm1622_vm0, %v1621_v0 }
 0x194   :  { %1398 = vmatprep.subr.bf16.mxu1 %v1621_v0 }
 0x197   :  { %1399 = vmatpush3.bf16.msra.mxu1 %v1734_v12 }
 0x198   :  { %1400 = vmatprep.subr.bf16.mxu1 %v1621_v0 }
 0x19b   :  { %1401 = vmatpush3.bf16.msra.mxu1 %v1740_v13 }
 0x19c   :  { %1402 = vmatprep.subr.bf16.mxu1 %v1621_v0 }
 0x19f   :  { %1403 = vmatpush3.bf16.msra.mxu1 %v1746_v14 }
 0x1a0   :  { %1404 = vmatprep.subr.bf16.mxu1 %v1621_v0 }
 0x1a3   :  { %1405 = vmatpush3.bf16.msra.mxu1 %v1752_v15 }
 0x1a4   :  { %1406 = vmatprep.subr.bf16.mxu1 %v1621_v0 }
 0x1a7   :  { %v735_v8 = vpop.f32.mrf.mxu0  ;;  %1407 = vmatpush3.bf16.msra.mxu1 %v1759_v17 }
 0x1a8   :  { %1408 = vmatprep.subr.bf16.mxu1 %v1621_v0  ;;  %v736_v10 = vadd.f32 %v1846_v24, %v735_v8 }
 0x1a9   :  { %v1394_v9 = vpop.f32.mrf.mxu0 }
 0x1aa   :  { %v742_v22 = vmax.f32 %v736_v10, 0.0 }
 0x1ab   :  { %v738_v16 = vpop.f32.mrf.mxu0  ;;  %1409 = vmatpush3.bf16.msra.mxu1 %v1767_v18 }
 0x1ac   :  { %v739_v20 = vadd.f32 %v1846_v24, %v738_v16  ;;  %1410 = vmatprep.subr.bf16.mxu1 %v1621_v0 }
 0x1ad   :  { %v1395_v21 = vpop.f32.mrf.mxu0 }
 0x1ae   :  { %v743_v23 = vmax.f32 %v739_v20, 0.0 }
 0x1af   :  { %1411 = vmatpush3.bf16.msra.mxu1 %v1773_v19 }
 0x1b0   :  { %v744_v25 = vpack.c.bf16 %v743_v23, %v742_v22  ;;  %1436 = vmatprep.subr.bf16.mxu1 %v1621_v0 }
 0x1b2   :  { %1413 = vmatmul.mubr.bf16.vlgmr.msra.gmra.mxu1 %v744_v25 }
 0x1b3   :  { %1437 = vmatpush3.bf16.msra.mxu1 %v1728_v11  ;;  %1452 = vmatprep.mubr.msk.bf16.mxu1 %vm1622_vm0, %v1621_v0 }
 0x1b4   :  { %1438 = vmatprep.subr.bf16.mxu1 %v1621_v0 }
 0x1b7   :  { %1439 = vmatpush3.bf16.msra.mxu1 %v1734_v12 }
 0x1b8   :  { %1440 = vmatprep.subr.bf16.mxu1 %v1621_v0 }
 0x1bb   :  { %1441 = vmatpush3.bf16.msra.mxu1 %v1740_v13 }
 0x1bc   :  { %1442 = vmatprep.subr.bf16.mxu1 %v1621_v0 }
 0x1bf   :  { %1443 = vmatpush3.bf16.msra.mxu1 %v1746_v14 }
 0x1c0   :  { %1444 = vmatprep.subr.bf16.mxu1 %v1621_v0 }
 0x1c3   :  { %1445 = vmatpush3.bf16.msra.mxu1 %v1752_v15 }
 0x1c4   :  { %1446 = vmatprep.subr.bf16.mxu1 %v1621_v0 }
 0x1c7   :  { %v833_v26 = vpop.f32.mrf.mxu0  ;;  %1447 = vmatpush3.bf16.msra.mxu1 %v1759_v17 }
 0x1c8   :  { %1448 = vmatprep.subr.bf16.mxu1 %v1621_v0  ;;  %v834_v28 = vadd.f32 %v1846_v24, %v833_v26 }
 0x1c9   :  { %v1434_v27 = vpop.f32.mrf.mxu0 }
 0x1ca   :  { %v840_v32 = vmax.f32 %v834_v28, 0.0 }
 0x1cb   :  { %v836_v29 = vpop.f32.mrf.mxu0  ;;  %1449 = vmatpush3.bf16.msra.mxu1 %v1767_v18 }
 0x1cc   :  { %v837_v30 = vadd.f32 %v1846_v24, %v836_v29  ;;  %1450 = vmatprep.subr.bf16.mxu1 %v1621_v0 }
 0x1cd   :  { %v1435_v31 = vpop.f32.mrf.mxu0 }
 0x1ce   :  { %v841_v33 = vmax.f32 %v837_v30, 0.0 }
 0x1cf   :  { %1451 = vmatpush3.bf16.msra.mxu1 %v1773_v19 }
 0x1d0   :  { %v842_v34 = vpack.c.bf16 %v841_v33, %v840_v32  ;;  %1476 = vmatprep.subr.bf16.mxu1 %v1621_v0 }
 0x1d2   :  { %v291_v35 = vpop.f32.mrf.mxu1  ;;  %1453 = vmatmul.mubr.bf16.vlgmr.msra.gmra.mxu1 %v842_v34 }
 0x1d3   :  { %1477 = vmatpush3.bf16.msra.mxu1 %v1728_v11  ;;  %1492 = vmatprep.mubr.msk.bf16.mxu1 %vm1622_vm0, %v1621_v0 }
 0x1d4   :  { %v1214_v36 = vpop.f32.mrf.mxu1  ;;  %1478 = vmatprep.subr.bf16.mxu1 %v1621_v0 }
 0x1d6   :  { %v294_v37 = vpop.f32.mrf.mxu1 }
 0x1d7   :  { %1479 = vmatpush3.bf16.msra.mxu1 %v1734_v12 }
 0x1d8   :  { %v1215_v38 = vpop.f32.mrf.mxu1  ;;  %1480 = vmatprep.subr.bf16.mxu1 %v1621_v0 }
 0x1db   :  { %1481 = vmatpush3.bf16.msra.mxu1 %v1740_v13 }
 0x1dc   :  { %1482 = vmatprep.subr.bf16.mxu1 %v1621_v0 }
 0x1df   :  { %1483 = vmatpush3.bf16.msra.mxu1 %v1746_v14 }
 0x1e0   :  { %1484 = vmatprep.subr.bf16.mxu1 %v1621_v0 }
 0x1e3   :  { %1485 = vmatpush3.bf16.msra.mxu1 %v1752_v15  ;;  %v2008_v15 = vld [vmem:[%s2034_s4] ss:$0 sm:$0xff]  ;;  %s1623_s4 = smov [#allocation8]  }
 0x1e4   :  { %1486 = vmatprep.subr.bf16.mxu1 %v1621_v0  ;;  %v292_v43 = vadd.f32 %v2008_v15, %v291_v35  ;;  %s993_s10 = sshll.u32 %s1623_s4, 4  ;;  %s994_s10 = int_to_ptr.vmem [resolvable:$true] %s993_s10 }
 0x1e5   :  { %s1590_s11 = scalar_lea.vmem %s994_s10, 256  ;;  %p1595_p2 = scmp.lt.s32.totalorder %s994_s10, %s994_s10 }
 0x1e6   :  { %v298_v45 = vmax.f32 %v292_v43, 0.0  ;;  %p1591_p1 = scmp.ne.s32.totalorder %s994_s10, %s1590_s11  ;;  %p1596_p3 = scmp.lt.s32.totalorder %s1590_s11, %s1590_s11 }
 0x1e7   :  { %v931_v11 = vpop.f32.mrf.mxu0  ;;  %1487 = vmatpush3.bf16.msra.mxu1 %v1759_v17 }
 0x1e8   :  { %1488 = vmatprep.subr.bf16.mxu1 %v1621_v0  ;;  %v932_v39 = vadd.f32 %v1846_v24, %v931_v11  ;;  %p1597_p4 = por %p1596_p3, %p1595_p2 }
 0x1e9   :  { %v1474_v12 = vpop.f32.mrf.mxu0 }
 0x1ea   :  { %v938_v41 = vmax.f32 %v932_v39, 0.0  ;;  %p1598_p5 = pnand %p1597_p4, %p1591_p1 }
 0x1eb   :  { %v934_v40 = vpop.f32.mrf.mxu0  ;;  %1489 = vmatpush3.bf16.msra.mxu1 %v1767_v18 }
 0x1ec   :  { %v935_v13 = vadd.f32 %v1846_v24, %v934_v40  ;;  %1490 = vmatprep.subr.bf16.mxu1 %v1621_v0  ;;  %v295_v0 = vadd.f32 %v2008_v15, %v294_v37 }
 0x1ed   :  { %v1475_v14 = vpop.f32.mrf.mxu0 }
 0x1ee   :  { %v939_v17 = vmax.f32 %v935_v13, 0.0  ;;  %v299_v51 = vmax.f32 %v295_v0, 0.0 }
 0x1ef   :  { %1491 = vmatpush3.bf16.msra.mxu1 %v1773_v19 }
 0x1f0   :  { %v940_v42 = vpack.c.bf16 %v939_v17, %v938_v41 }
 0x1f2   :  { %v387_v44 = vpop.f32.mrf.mxu1  ;;  %1493 = vmatmul.mubr.bf16.vlgmr.msra.gmra.mxu1 %v940_v42 }
 0x1f3   :  { %v388_v18 = vadd.f32 %v2008_v15, %v387_v44 }
 0x1f4   :  { %v1254_v24 = vpop.f32.mrf.mxu1 }
 0x1f5   :  { %v394_v46 = vmax.f32 %v388_v18, 0.0 }
 0x1f6   :  { %v390_v47 = vpop.f32.mrf.mxu1 }
 0x1f7   :  { %v396_v48 = vmax.f32 %v298_v45, %v394_v46  ;;  %v391_v49 = vadd.f32 %v2008_v15, %v390_v47 }
 0x1f8   :  { %v1255_v50 = vpop.f32.mrf.mxu1 }
 0x1f9   :  { %v395_v52 = vmax.f32 %v391_v49, 0.0 }
 0x1fb   :  { %v397_v19 = vmax.f32 %v299_v51, %v395_v52 }
 0x212   :  { %v485_v53 = vpop.f32.mrf.mxu1 }
 0x213   :  { %v486_v54 = vadd.f32 %v2008_v15, %v485_v53 }
 0x214   :  { %v1294_v55 = vpop.f32.mrf.mxu1 }
 0x215   :  { %v492_v56 = vmax.f32 %v486_v54, 0.0 }
 0x216   :  { %v488_v57 = vpop.f32.mrf.mxu1 }
 0x217   :  { %v494_v58 = vmax.f32 %v396_v48, %v492_v56  ;;  %v489_v59 = vadd.f32 %v2008_v15, %v488_v57 }
 0x218   :  { %v1295_v60 = vpop.f32.mrf.mxu1 }
 0x219   :  { %v493_v61 = vmax.f32 %v489_v59, 0.0 }
 0x21b   :  { %v495_v62 = vmax.f32 %v397_v19, %v493_v61 }
 0x232   :  { %v583_v63 = vpop.f32.mrf.mxu1 }
 0x233   :  { %v584_v1 = vadd.f32 %v2008_v15, %v583_v63 }
 0x234   :  { %v1334_v2 = vpop.f32.mrf.mxu1 }
 0x235   :  { %v590_v3 = vmax.f32 %v584_v1, 0.0 }
 0x236   :  { %v586_v4 = vpop.f32.mrf.mxu1 }
 0x237   :  { %v592_v5 = vmax.f32 %v494_v58, %v590_v3  ;;  %v587_v6 = vadd.f32 %v2008_v15, %v586_v4 }
 0x238   :  { %v1335_v7 = vpop.f32.mrf.mxu1 }
 0x239   :  { %v591_v8 = vmax.f32 %v587_v6, 0.0 }
 0x23b   :  { %v593_v9 = vmax.f32 %v495_v62, %v591_v8 }
 0x252   :  { %v681_v10 = vpop.f32.mrf.mxu1 }
 0x253   :  { %v682_v16 = vadd.f32 %v2008_v15, %v681_v10 }
 0x254   :  { %v1374_v20 = vpop.f32.mrf.mxu1 }
 0x255   :  { %v688_v21 = vmax.f32 %v682_v16, 0.0 }
 0x256   :  { %v684_v22 = vpop.f32.mrf.mxu1 }
 0x257   :  { %v690_v23 = vmax.f32 %v592_v5, %v688_v21  ;;  %v685_v25 = vadd.f32 %v2008_v15, %v684_v22 }
 0x258   :  { %v1375_v26 = vpop.f32.mrf.mxu1 }
 0x259   :  { %v689_v27 = vmax.f32 %v685_v25, 0.0 }
 0x25b   :  { %v691_v28 = vmax.f32 %v593_v9, %v689_v27 }
 0x272   :  { %v779_v29 = vpop.f32.mrf.mxu1 }
 0x273   :  { %v780_v37 = vadd.f32 %v2008_v15, %v779_v29 }
 0x274   :  { %v1414_v30 = vpop.f32.mrf.mxu1 }
 0x275   :  { %v786_v11 = vmax.f32 %v780_v37, 0.0 }
 0x276   :  { %v782_v31 = vpop.f32.mrf.mxu1 }
 0x277   :  { %v783_v12 = vadd.f32 %v2008_v15, %v782_v31  ;;  %v788_v14 = vmax.f32 %v690_v23, %v786_v11 }
 0x278   :  { %v1415_v32 = vpop.f32.mrf.mxu1 }
 0x279   :  { %v787_v41 = vmax.f32 %v783_v12, 0.0 }
 0x27b   :  { %v789_v45 = vmax.f32 %v691_v28, %v787_v41 }
 0x292   :  { %v877_v33 = vpop.f32.mrf.mxu1 }
 0x293   :  { %v878_v38 = vadd.f32 %v2008_v15, %v877_v33 }
 0x294   :  { %v1454_v34 = vpop.f32.mrf.mxu1 }
 0x295   :  { %v884_v39 = vmax.f32 %v878_v38, 0.0 }
 0x296   :  { %v880_v35 = vpop.f32.mrf.mxu1 }
 0x297   :  { %v881_v40 = vadd.f32 %v2008_v15, %v880_v35  ;;  %v886_v43 = vmax.f32 %v788_v14, %v884_v39 }
 0x298   :  { %v1455_v36 = vpop.f32.mrf.mxu1 }
 0x299   :  { %v885_v44 = vmax.f32 %v881_v40, 0.0 }
 0x29b   :  { %v887_v48 = vmax.f32 %v789_v45, %v885_v44 }
 0x2b2   :  { %v975_v13 = vpop.f32.mrf.mxu1 }
 0x2b3   :  { %v976_v17 = vadd.f32 %v2008_v15, %v975_v13 }
 0x2b4   :  { %v1494_v42 = vpop.f32.mrf.mxu1 }
 0x2b5   :  { %v982_v18 = vmax.f32 %v976_v17, 0.0 }
 0x2b6   :  { %v978_v24 = vpop.f32.mrf.mxu1 }
 0x2b7   :  { %v984_v0 = vmax.f32 %v886_v43, %v982_v18  ;;  %v979_v46 = vadd.f32 %v2008_v15, %v978_v24 }
 0x2b8   :  { %v1495_v47 = vpop.f32.mrf.mxu1 }
 0x2b9   :  { %986 = vst [vmem:[#allocation8] sm:$0xff] %v984_v0  ;;  %v983_v49 = vmax.f32 %v979_v46, 0.0 }
 0x2bb   :  { %v985_v50 = vmax.f32 %v887_v48, %v983_v49 }
 0x2bd   :  { %987 = vst [vmem:[#allocation8 + $0x8] sm:$0xff] %v985_v50 }
 0x2be   :  { %1601 = shalt.err (!%p1598_p5)
}
 0x2bf   :  { %s1624_s12 = smov 128   ;;  %s1625_s13 = smov 8  }
 0x2c0   :  { %999 = dma.vmem_to_hbm [thread:$0]  %s994_s10, 256, %s2035_s5, [#allocation4], %s1624_s12, %s1624_s12, %s1625_s13  }
 0x2c1   :  { %1614 = dma.done.wait [#allocation4], 256  }
 0x2c2   :  { %1615 = vsyncadd [#allocation4], 4294967040 }
 0x2c3   :  { %1003 = vsyncpa [#allocation3], 1 }
 0x2c4   :  { %1004 = vsyncpa [#allocation6], 1 }
 0x2c5   :  { %1005 = vsyncpa [#allocation4], 1 }

</bundles_post_ra>
